<compile_context>
chip_gen: v7x
topology: tpu7x:2x2x1
jax: 0.10.0
libtpu: 0.0.40
codegen_flags: <defaults>
</compile_context>

<pallas_src>
import jax
import jax.numpy as jnp
from jax.experimental import pallas as pl
from jax.experimental.pallas import tpu as pltpu


def res_mlp_kernel(x_ref, w1_ref, b1_ref, w2_ref, b2_ref, out_ref):
    """Fused Linear(5,30) -> ReLU -> (Dropout=id) -> Linear(30,1) -> ReLU.

    x_ref   : (TB, 5)   input tile (batch rows)
    w1_ref  : (5, 30)   linear1 weight, pre-transposed
    b1_ref  : (1, 30)   linear1 bias (row vector)
    w2_ref  : (30, 1)   linear2 weight, pre-transposed
    b2_ref  : (1, 1)    linear2 bias
    out_ref : (TB, 1)   output tile
    """
    x = x_ref[...]                                               # (TB, 5)

    h = jnp.dot(x, w1_ref[...], preferred_element_type=jnp.float32)
    h = jnp.maximum(h + b1_ref[...], 0.0)                        # (TB, 30)

    # Dropout(p=0.3): identity in eval mode.

    y = jnp.dot(h, w2_ref[...], preferred_element_type=jnp.float32)
    out_ref[...] = jnp.maximum(y + b2_ref[...], 0.0)             # (TB, 1)


def res_model_forward(x, params, *, batch_tile=8):
    """Python wrapper mirroring RESmodel.forward (eval-mode dropout).

    x : (B, 5) float32  ->  (B, 1) float32
    """
    x = x.astype(jnp.float32)
    B, F = x.shape
    assert F == 5, f"expected 5 input features, got {F}"

    # PyTorch layouts: w1 (30, 5), b1 (30,), w2 (1, 30), b2 (1,)
    w1_t = params["w1"].T.astype(jnp.float32)                    # (5, 30)
    b1_r = params["b1"].reshape(1, -1).astype(jnp.float32)       # (1, 30)
    w2_t = params["w2"].T.astype(jnp.float32)                    # (30, 1)
    b2_r = params["b2"].reshape(1, 1).astype(jnp.float32)        # (1, 1)

    H = w1_t.shape[1]

    # Pad the batch to a multiple of the tile so block shapes stay
    # (8k, full-dim) aligned; padded rows are sliced off at the end.
    TB = batch_tile
    B_pad = int(pl.cdiv(B, TB)) * TB
    if B_pad != B:
        x = jnp.pad(x, ((0, B_pad - B), (0, 0)))

    grid = (B_pad // TB,)

    out = pl.pallas_call(
        res_mlp_kernel,
        out_shape=jax.ShapeDtypeStruct((B_pad, 1), jnp.float32),
        grid=grid,
        in_specs=[
            pl.BlockSpec((TB, F), lambda i: (i, 0)),     # x: tiled over batch
            pl.BlockSpec((F, H), lambda i: (0, 0)),      # w1: resident
            pl.BlockSpec((1, H), lambda i: (0, 0)),      # b1: resident
            pl.BlockSpec((H, 1), lambda i: (0, 0)),      # w2: resident
            pl.BlockSpec((1, 1), lambda i: (0, 0)),      # b2: resident
        ],
        out_specs=pl.BlockSpec((TB, 1), lambda i: (i, 0)),
        compiler_params=pltpu.CompilerParams(
            dimension_semantics=("parallel",)),
    )(x, w1_t, b1_r, w2_t, b2_r)

    return out[:B]


def _reference_forward(x, params):
    """Pure-JAX reference for correctness checking (eval-mode dropout)."""
    h = jnp.maximum(x @ params["w1"].T + params["b1"], 0.0)
    y = jnp.maximum(h @ params["w2"].T + params["b2"], 0.0)
    return y


def init_params(key):
    """Deterministic synthetic parameter init (PyTorch Linear shapes/scales)."""
    ks = jax.random.split(key, 4)
    s1 = 1.0 / jnp.sqrt(5.0)
    s2 = 1.0 / jnp.sqrt(30.0)
    return {
        "w1": jax.random.uniform(ks[0], (30, 5), jnp.float32, -s1, s1),
        "b1": jax.random.uniform(ks[1], (30,), jnp.float32, -s1, s1),
        "w2": jax.random.uniform(ks[2], (1, 30), jnp.float32, -s2, s2),
        "b2": jax.random.uniform(ks[3], (1,), jnp.float32, -s2, s2),
    }


if __name__ == "__main__":
    batch, in_features = 8, 5
    key = jax.random.PRNGKey(0)
    k_x, k_p = jax.random.split(key, 2)

    x = jax.random.normal(k_x, (batch, in_features), jnp.float32)
    params = init_params(k_p)

    out = res_model_forward(x, params)
    jax.block_until_ready(out)

    ref = _reference_forward(x, params)
    assert out.shape == (batch, 1)
    assert jnp.allclose(out, ref, atol=1e-5, rtol=1e-5), (out, ref)

    print("KERNEL_OK")
</pallas_src>

<mosaic_0001>
module attributes {stable_mosaic.version = 11 : i64} {
  func.func @res_mlp_kernel(%arg0: i32, %arg1: memref<8x5xf32, #tpu.memory_space<vmem>>, %arg2: memref<5x30xf32, #tpu.memory_space<vmem>>, %arg3: memref<1x30xf32, #tpu.memory_space<vmem>>, %arg4: memref<30x1xf32, #tpu.memory_space<vmem>>, %arg5: memref<1x1xf32, #tpu.memory_space<vmem>>, %arg6: memref<8x1xf32, #tpu.memory_space<vmem>>) attributes {dimension_semantics = [#tpu.dimension_semantics<parallel>], iteration_bounds = array<i64: 1>, scalar_prefetch = 0 : i64, scratch_operands = 0 : i64, tpu.core_type = #tpu.core_type<tc>, window_params = [{transform_indices = @transform_0, window_bounds = array<i64: 8, 5>}, {pipeline_mode = #tpu.pipeline_mode<synchronous>, transform_indices = @transform_1, window_bounds = array<i64: 5, 30>}, {pipeline_mode = #tpu.pipeline_mode<synchronous>, transform_indices = @transform_2, window_bounds = array<i64: 1, 30>}, {pipeline_mode = #tpu.pipeline_mode<synchronous>, transform_indices = @transform_3, window_bounds = array<i64: 30, 1>}, {pipeline_mode = #tpu.pipeline_mode<synchronous>, transform_indices = @transform_4, window_bounds = array<i64: 1, 1>}, {transform_indices = @transform_5, window_bounds = array<i64: 8, 1>}]} {
    %c0 = arith.constant 0 : index
    %c0_0 = arith.constant 0 : index
    %0 = vector.load %arg1[%c0, %c0_0] : memref<8x5xf32, #tpu.memory_space<vmem>>, vector<8x5xf32>
    %c0_1 = arith.constant 0 : index
    %c0_2 = arith.constant 0 : index
    %1 = vector.load %arg2[%c0_1, %c0_2] : memref<5x30xf32, #tpu.memory_space<vmem>>, vector<5x30xf32>
    %cst = arith.constant dense<0.000000e+00> : vector<8x30xf32>
    %2 = tpu.matmul %0, %1, %cst {dimension_numbers = #tpu.dot_dimension_numbers<[1], [0], [0], [1], [0, 0, 1, 1], [], []>} : vector<8x5xf32>, vector<5x30xf32>, vector<8x30xf32> -> vector<8x30xf32>
    %c0_3 = arith.constant 0 : index
    %c0_4 = arith.constant 0 : index
    %3 = vector.load %arg3[%c0_3, %c0_4] : memref<1x30xf32, #tpu.memory_space<vmem>>, vector<1x30xf32>
    %4 = vector.broadcast %3 : vector<1x30xf32> to vector<8x30xf32>
    %5 = arith.addf %2, %4 : vector<8x30xf32>
    %cst_5 = arith.constant 0.000000e+00 : f32
    %6 = vector.broadcast %cst_5 : f32 to vector<8x30xf32>
    %7 = arith.maximumf %5, %6 : vector<8x30xf32>
    %c0_6 = arith.constant 0 : index
    %c0_7 = arith.constant 0 : index
    %8 = vector.load %arg4[%c0_6, %c0_7] : memref<30x1xf32, #tpu.memory_space<vmem>>, vector<30x1xf32>
    %cst_8 = arith.constant dense<0.000000e+00> : vector<8x1xf32>
    %9 = tpu.matmul %7, %8, %cst_8 {dimension_numbers = #tpu.dot_dimension_numbers<[1], [0], [0], [1], [0, 0, 1, 1], [], []>} : vector<8x30xf32>, vector<30x1xf32>, vector<8x1xf32> -> vector<8x1xf32>
    %c0_9 = arith.constant 0 : index
    %c0_10 = arith.constant 0 : index
    %10 = vector.load %arg5[%c0_9, %c0_10] : memref<1x1xf32, #tpu.memory_space<vmem>>, vector<1x1xf32>
    %11 = vector.broadcast %10 : vector<1x1xf32> to vector<8x1xf32>
    %12 = arith.addf %9, %11 : vector<8x1xf32>
    %cst_11 = arith.constant 0.000000e+00 : f32
    %13 = vector.broadcast %cst_11 : f32 to vector<8x1xf32>
    %14 = arith.maximumf %12, %13 : vector<8x1xf32>
    %c0_12 = arith.constant 0 : index
    %c0_13 = arith.constant 0 : index
    %15 = vector.load %arg6[%c0_12, %c0_13] : memref<8x1xf32, #tpu.memory_space<vmem>>, vector<8x1xf32>
    tpu.vector_store %arg6[%c0_12, %c0_13], %14 {strides = array<i32>} : memref<8x1xf32, #tpu.memory_space<vmem>>, vector<8x1xf32>,
    return
  }
  func.func @transform_0(%arg0: i32) -> (i32, i32) {
    %c0_i32 = arith.constant 0 : i32
    %c0_i32_0 = arith.constant 0 : i32
    return %arg0, %c0_i32 : i32, i32
  }
  func.func @transform_1(%arg0: i32) -> (i32, i32) {
    %c0_i32 = arith.constant 0 : i32
    %c0_i32_0 = arith.constant 0 : i32
    %c0_i32_1 = arith.constant 0 : i32
    return %c0_i32, %c0_i32_0 : i32, i32
  }
  func.func @transform_2(%arg0: i32) -> (i32, i32) {
    %c0_i32 = arith.constant 0 : i32
    %c0_i32_0 = arith.constant 0 : i32
    %c0_i32_1 = arith.constant 0 : i32
    return %c0_i32, %c0_i32_0 : i32, i32
  }
  func.func @transform_3(%arg0: i32) -> (i32, i32) {
    %c0_i32 = arith.constant 0 : i32
    %c0_i32_0 = arith.constant 0 : i32
    %c0_i32_1 = arith.constant 0 : i32
    return %c0_i32, %c0_i32_0 : i32, i32
  }
  func.func @transform_4(%arg0: i32) -> (i32, i32) {
    %c0_i32 = arith.constant 0 : i32
    %c0_i32_0 = arith.constant 0 : i32
    %c0_i32_1 = arith.constant 0 : i32
    return %c0_i32, %c0_i32_0 : i32, i32
  }
  func.func @transform_5(%arg0: i32) -> (i32, i32) {
    %c0_i32 = arith.constant 0 : i32
    %c0_i32_0 = arith.constant 0 : i32
    return %arg0, %c0_i32 : i32, i32
  }
}

</mosaic_0001>

<bundles_post_ra>
// kernel: tpu_custom_call.1
= control target key start
LH: loop header
LB: loop body
LE: loop exit
PB: predicated region body
PF: predicated region fallthrough
CT: control target
= control target key end

     0   :  { %vm35_vm0 = vcmask 1044480   ;;  %vm31_vm1 = vcmask 39936   ;;  %v246_v0 = vmov 0.0   ;;  %vm247_vm2 = vmmov 0   ;;  %s307_s1 = inlined_call_operand.vmem [shape: f32[5,30], index: 1, kind: input, shape index: {}]   ;;  %s308_s0 = inlined_call_operand.vmem [shape: f32[8,5], index: 0, kind: input, shape index: {}]   ;;  %s309_s3 = inlined_call_operand.vmem [shape: f32[30,1], index: 3, kind: input, shape index: {}]   ;;  %s310_s4 = inlined_call_operand.<no memory space> [shape: f32[1,1], index: 4, kind: input, shape index: {}]   ;;  %s311_s2 = inlined_call_operand.vmem [shape: f32[1,30], index: 2, kind: input, shape index: {}]   ;;  %s312_s5 = inlined_call_operand.vmem [shape: f32[8,1], index: 5, kind: output, shape index: {}]  }
   0x1   :  { %219 = vmatprep.subr.mxu0 %v246_v0  ;;  %v23_v1 = vld [vmem:[%s307_s1] sm:$0x1f]  ;;  %221 = vmatprep.mubr.msk.f32.mxu0 %vm247_vm2, %v246_v0  ;;  %v248_v4 = vmov 0.0|0.0   ;;  %v111_v5 = vld [vmem:[%s309_s3 + $0x8] sm:$0xff]  ;;  %v112_v7 = vld [vmem:[%s309_s3 + $0x10] sm:$0xff]  ;;  %vm125_vm3 = vcmask 1045504   ;;  %v10_v10 = vstv %s310_s4 }
   0x2   :  { %v22_v2 = vld [vmem:[%s308_s0] sm:$0xff]  ;;  %220 = vmatpush3.msk.msra.mxu0 %vm35_vm0, %v23_v1  ;;  %235 = vmatprep.subr.bf16.mxu1 %v248_v4  ;;  %v113_v8 = vld [vmem:[%s309_s3 + $0x18] sm:$0x3f]  ;;  %vm249_vm4 = vmmov 1   ;;  %11 = vst [vmem:[#allocation2] sm:$0x1] %v10_v10 }
   0x3   :  { %v110_v3 = vld [vmem:[%s309_s3] sm:$0xff]  ;;  %222 = vmatmul.mubr.msk.f32.vlgmr.msra.gmra.mrb[0].mxu0 %vm31_vm1, %v22_v2  ;;  %232 = vmatprep.mubr.msk.f32.mxu1 %vm247_vm2, %v246_v0  ;;  %v239_v9 = vpack.c.bf16 %v113_v8, %v112_v7  ;;  %vm240_vm5 = vmpackc.low %vm125_vm3, %vm249_vm4  ;;  %vm121_vm6 = vcmask 244736   ;;  %vm200_vm7 = vcmask 7168  }
   0x4   :  { %v236_v6 = vpack.c.bf16 %v111_v5, %v110_v3  ;;  %v206_v11 = vld [vmem:[%s311_s2] ss:$0 sm:$0xff] }
   0x6   :  { %237 = vmatpush3.bf16.msra.mxu1 %v236_v6 }
   0x7   :  { %238 = vmatprep.subr.bf16.mxu1 %v248_v4 }
   0x9   :  { %v209_v16 = vld [vmem:[#allocation2] ss:$0 sm:$0xff] }
   0xa   :  { %241 = vmatpush3.bf16.msk.msra.mxu1 %vm240_vm5, %v239_v9 }
  0xd6   :  { %v105_v12 = vpop.f32.mrb[0].mxu0 }
  0xd7   :  { %v106_v13 = vadd.f32 %v206_v11, %v105_v12  ;;  %v223_v14 = vpop.f32.mrb[1].mxu0 }
  0xd9   :  { %v109_v15 = vmax.f32 %v106_v13, 0.0 }
  0xdb   :  { %233 = vmatmul.mubr.msk.f32.vlgmr.msra.gmra.mrb[0].mxu1 %vm121_vm6, %v109_v15 }
 0x1ae   :  { %v195_v17 = vpop.f32.mrb[0].mxu1 }
 0x1af   :  { %v196_v18 = vadd.f32 %v209_v16, %v195_v17  ;;  %v234_v19 = vpop.f32.mrb[1].mxu1 }
 0x1b1   :  { %v199_v20 = vmax.f32 %v196_v18, 0.0 }
 0x1b3   :  { %201 = vst.msk [vmem:[%s312_s5] sm:$0xff] %vm200_vm7, %v199_v20 }

</bundles_post_ra>
